<compile_context>
chip_gen: v6e
topology: v6e:2x2x1
jax: 0.10.0
libtpu: 0.0.40
codegen_flags: <defaults>
</compile_context>

<pallas_src>
import functools

import jax
import jax.numpy as jnp
import numpy as np
from jax import lax
from jax.experimental import pallas as pl
from jax.experimental.pallas import tpu as pltpu


# ------------------------------------------------------------------ helpers --
def perspectiveprojectionnp(fovy, ratio=1.0):
    """kaolin-style 3x1 perspective projection column."""
    tanfov = np.tan(fovy / 2.0)
    return np.array([[1.0 / (ratio * tanfov)], [1.0 / tanfov], [-1.0]], dtype=np.float32)


def _pick_tile(n, candidates=(2048, 1024, 512, 256, 128)):
    """Largest lane-dense pixel tile that divides n (falls back to full n)."""
    for c in candidates:
        if n % c == 0:
            return c
    return n


# ------------------------------------------------- kernel 1: camera project --
def _project_kernel(v_ref, cam_ref, o_ref, *, proj0, proj1, proj2):
    # cams untiled in SMEM: [tx, ty, tz, qr, qi, qj, qk] per batch row
    b = pl.program_id(0)
    tx = cam_ref[b, 0]
    ty = cam_ref[b, 1]
    tz = cam_ref[b, 2]
    qr = cam_ref[b, 3]
    qi = cam_ref[b, 4]
    qj = cam_ref[b, 5]
    qk = cam_ref[b, 6]

    # quaternion_to_matrix (real part first), identical formula to the PyTorch code
    two_s = 2.0 / (qr * qr + qi * qi + qj * qj + qk * qk)
    r00 = 1.0 - two_s * (qj * qj + qk * qk)
    r01 = two_s * (qi * qj - qk * qr)
    r02 = two_s * (qi * qk + qj * qr)
    r10 = two_s * (qi * qj + qk * qr)
    r11 = 1.0 - two_s * (qi * qi + qk * qk)
    r12 = two_s * (qj * qk - qi * qr)
    r20 = two_s * (qi * qk - qj * qr)
    r21 = two_s * (qj * qk + qi * qr)
    r22 = 1.0 - two_s * (qi * qi + qj * qj)

    # lane-dense vertex rows: (1, Ppad) each
    vx = v_ref[0, 0:1, :]
    vy = v_ref[0, 1:2, :]
    vz = v_ref[0, 2:3, :]

    # camshift = -translation  =>  (p - camshift) = p + translation
    sx = vx + tx
    sy = vy + ty
    sz = vz + tz

    # p_cam = R @ (p + t)
    cx = r00 * sx + r01 * sy + r02 * sz
    cy = r10 * sx + r11 * sy + r12 * sz
    cz = r20 * sx + r21 * sy + r22 * sz

    w = cz * proj2  # proj2 = -1  =>  w = -z (positive in front of camera)
    inv_w = jnp.where(jnp.abs(w) > 1e-8, pl.reciprocal(w, approx=True), 0.0)

    # full-lane-width stores (Ppad lanes), one sublane row each
    o_ref[0, 0:1, :] = cx * proj0 * inv_w   # NDC x
    o_ref[0, 1:2, :] = cy * proj1 * inv_w   # NDC y
    o_ref[0, 2:3, :] = w                    # depth


def camera_project(verts_t, cams, proj3x1):
    """verts_t: (B, 3, Ppad) channel-major vertices.  Returns (B, 3, Ppad): x_ndc,y_ndc,depth."""
    B, _, Ppad = verts_t.shape
    kernel = functools.partial(
        _project_kernel,
        proj0=float(proj3x1[0, 0]),
        proj1=float(proj3x1[1, 0]),
        proj2=float(proj3x1[2, 0]),
    )
    return pl.pallas_call(
        kernel,
        out_shape=jax.ShapeDtypeStruct((B, 3, Ppad), jnp.float32),
        grid=(B,),
        in_specs=[
            pl.BlockSpec((1, 3, Ppad), lambda b: (b, 0, 0)),
            pl.BlockSpec(memory_space=pltpu.MemorySpace.SMEM),   # whole (B,7) in SMEM
        ],
        out_specs=pl.BlockSpec((1, 3, Ppad), lambda b: (b, 0, 0)),
        compiler_params=pltpu.CompilerParams(dimension_semantics=("arbitrary",)),
    )(verts_t, cams)


# ---------------------------------------------------- kernel 2: rasterizer --
def _raster_kernel(tri_ref, tex_ref, out_ref, zbuf, ubuf, vbuf, cbuf, pxbuf, pybuf,
                   *, H, W, TH, TW, TILE, FC):
    p = pl.program_id(1)
    fc = pl.program_id(2)
    n_fc = pl.num_programs(2)

    # init running z-buffer / UV / coverage carries + cache pixel NDC coords for this tile
    @pl.when(fc == 0)
    def _():
        lin = p * TILE + lax.broadcasted_iota(jnp.int32, (1, TILE), 1)
        jx = (lin % W).astype(jnp.float32)
        iy = (lin // W).astype(jnp.float32)
        pxbuf[...] = (jx + 0.5) * (2.0 / W) - 1.0      # NDC x in [-1,1], +x right
        pybuf[...] = 1.0 - (iy + 0.5) * (2.0 / H)      # NDC y in [-1,1], +y up
        zbuf[...] = jnp.full((1, TILE), jnp.inf, jnp.float32)
        ubuf[...] = jnp.zeros((1, TILE), jnp.float32)
        vbuf[...] = jnp.zeros((1, TILE), jnp.float32)
        cbuf[...] = jnp.zeros((1, TILE), jnp.float32)

    px = pxbuf[...]
    py = pybuf[...]

    # packed per-face attributes for this face chunk: one (FC,16) tile load
    tri = tri_ref[0]
    x0 = tri[:, 0:1];   y0 = tri[:, 1:2]
    x1 = tri[:, 2:3];   y1 = tri[:, 3:4]
    x2 = tri[:, 4:5];   y2 = tri[:, 5:6]
    z0 = tri[:, 6:7];   z1 = tri[:, 7:8];   z2 = tri[:, 8:9]
    u0 = tri[:, 9:10];  v0 = tri[:, 10:11]
    u1 = tri[:, 11:12]; v1 = tri[:, 12:13]
    u2 = tri[:, 13:14]; v2 = tri[:, 14:15]

    # per-face constants (computed once per chunk, reused across all pixels)
    area = (x1 - x0) * (y2 - y0) - (x2 - x0) * (y1 - y0)              # (FC,1)
    ok_area = jnp.abs(area) > 1e-8
    inv_area = jnp.where(ok_area, pl.reciprocal(area, approx=True), 0.0)
    a0 = (y1 - y2) * inv_area
    b0 = (x2 - x1) * inv_area
    c0 = (x1 * y2 - x2 * y1) * inv_area
    a1 = (y2 - y0) * inv_area
    b1 = (x0 - x2) * inv_area
    c1 = (x2 * y0 - x0 * y2) * inv_area

    # barycentric coordinates for every (face, pixel) pair -> (FC, TILE)
    w0 = a0 * px + b0 * py + c0
    w1 = a1 * px + b1 * py + c1
    w2 = 1.0 - w0 - w1
    inside = (w0 >= 0.0) & (w1 >= 0.0) & (w2 >= 0.0) & ok_area
    depth = w0 * z0 + w1 * z1 + w2 * z2
    valid = inside & (depth > 1e-6)

    # chunk-local winner: depth min, exact tie-break on lowest face index
    dsel = jnp.where(valid, depth, jnp.float32(jnp.inf))
    dmin = jnp.min(dsel, axis=0, keepdims=True)                       # (1,TILE)
    is_min = valid & (dsel <= dmin)
    fidx = lax.broadcasted_iota(jnp.int32, (FC, TILE), 0)
    fsel = jnp.where(is_min, fidx, FC)
    fwin = jnp.min(fsel, axis=0, keepdims=True)
    best = ((fsel == fwin) & is_min).astype(jnp.float32)              # exactly one winner/pixel

    u_blk = jnp.sum(best * (w0 * u0 + w1 * u1 + w2 * u2), axis=0, keepdims=True)
    v_blk = jnp.sum(best * (w0 * v0 + w1 * v1 + w2 * v2), axis=0, keepdims=True)
    cov_blk = jnp.max(best, axis=0, keepdims=True)

    # merge into running z-buffer (strict '<': earlier chunks / lower face idx win ties;
    # dmin==inf when no face covers the pixel, so no extra coverage check is needed)
    take = dmin < zbuf[...]
    zbuf[...] = jnp.where(take, dmin, zbuf[...])
    ubuf[...] = jnp.where(take, u_blk, ubuf[...])
    vbuf[...] = jnp.where(take, v_blk, vbuf[...])
    cbuf[...] = jnp.maximum(cbuf[...], cov_blk)

    # finalize: nearest-neighbor texture lookup + single lane-dense store per channel
    @pl.when(fc == n_fc - 1)
    def _():
        cov = cbuf[...]
        tix = jnp.clip(jnp.floor(ubuf[...] * TW), 0.0, TW - 1.0).astype(jnp.int32)  # (1,TILE)
        tiy = jnp.clip(jnp.floor(vbuf[...] * TH), 0.0, TH - 1.0).astype(jnp.int32)  # (1,TILE)
        # column select via bf16 MXU matmul: (3*TH, TW) @ (TW, TILE) -> (3*TH, TILE)
        col_ids = lax.broadcasted_iota(jnp.int32, (TW, TILE), 0)
        col_oh = (col_ids == tix).astype(jnp.float32).astype(jnp.bfloat16)
        csel = jnp.dot(tex_ref[0], col_oh, preferred_element_type=jnp.float32)
        # row select via VPU multiply + sublane reduce
        row_ids = lax.broadcasted_iota(jnp.int32, (TH, TILE), 0)
        row_oh = (row_ids == tiy).astype(jnp.float32)                                # (TH,TILE)
        r = jnp.sum(csel[0 * TH:1 * TH] * row_oh, axis=0, keepdims=True)
        g = jnp.sum(csel[1 * TH:2 * TH] * row_oh, axis=0, keepdims=True)
        b = jnp.sum(csel[2 * TH:3 * TH] * row_oh, axis=0, keepdims=True)
        out_ref[0, 0:1, :] = r * cov
        out_ref[0, 1:2, :] = g * cov
        out_ref[0, 2:3, :] = b * cov


def rasterize(tri_packed, tex2d, H, W, TH, TW, tile_hw, face_chunk):
    B, Fpad, _ = tri_packed.shape
    HW = H * W
    num_pt = HW // tile_hw
    num_fc = Fpad // face_chunk
    kernel = functools.partial(
        _raster_kernel, H=H, W=W, TH=TH, TW=TW, TILE=tile_hw, FC=face_chunk)
    out = pl.pallas_call(
        kernel,
        out_shape=jax.ShapeDtypeStruct((B, 3, HW), jnp.float32),
        grid=(B, num_pt, num_fc),
        in_specs=[
            pl.BlockSpec((1, face_chunk, 16), lambda b, p, f: (b, f, 0)),
            pl.BlockSpec((1, 3 * TH, TW), lambda b, p, f: (b, 0, 0)),
        ],
        out_specs=pl.BlockSpec((1, 3, tile_hw), lambda b, p, f: (b, 0, p)),
        scratch_shapes=[
            pltpu.VMEM((1, tile_hw), jnp.float32),   # running min depth
            pltpu.VMEM((1, tile_hw), jnp.float32),   # winning u
            pltpu.VMEM((1, tile_hw), jnp.float32),   # winning v
            pltpu.VMEM((1, tile_hw), jnp.float32),   # coverage
            pltpu.VMEM((1, tile_hw), jnp.float32),   # cached pixel NDC x
            pltpu.VMEM((1, tile_hw), jnp.float32),   # cached pixel NDC y
        ],
        compiler_params=pltpu.CompilerParams(
            dimension_semantics=("parallel", "parallel", "arbitrary"),
            vmem_limit_bytes=32 * 1024 * 1024,
        ),
    )(tri_packed, tex2d)
    return out.reshape(B, 3, H, W)


# ----------------------------------------------------------- forward (glue) --
def neural_renderer_forward(vertices, faces, cams, uv_sampler, img_size=16, textures=None):
    """JAX/Pallas equivalent of NeuralRenderer.forward (textures=None path)."""
    B, P, _ = vertices.shape
    F = faces.shape[1]
    H = W = img_size
    HW = H * W

    # camera setup (matches forward): fovy = 90deg, aspect = 1
    camproj = perspectiveprojectionnp(90.0 / 180.0 * np.pi, 1.0)

    if textures is None:
        # textures = torch.ones(B, 3, img_size, img_size)
        textures = jnp.ones((B, 3, img_size, img_size), dtype=jnp.float32)
    TH, TW = textures.shape[2], textures.shape[3]

    # ---- Kernel 1: lane-dense projection.  vertices -> (B, 3, Ppad), P in lanes. ----
    Ppad = max(128, int(np.ceil(P / 128)) * 128)
    verts_t = jnp.swapaxes(vertices, 1, 2).astype(jnp.float32)        # (B, 3, P)
    verts_t = jnp.pad(verts_t, ((0, 0), (0, 0), (0, Ppad - P)))
    pv = camera_project(verts_t, cams.astype(jnp.float32), camproj)   # (B,3,Ppad): x,y,depth

    # ---- glue (XLA): per-face attribute gather + packing into one (B, Fpad, 16) slab ----
    f = faces[0].astype(jnp.int32).reshape(-1)                        # (3F,)
    xg = jnp.take(pv[:, 0, :], f, axis=1).reshape(B, F, 3)
    yg = jnp.take(pv[:, 1, :], f, axis=1).reshape(B, F, 3)
    wg = jnp.take(pv[:, 2, :], f, axis=1).reshape(B, F, 3)
    ug = jnp.take(uv_sampler[..., 0].astype(jnp.float32), f, axis=1).reshape(B, F, 3)
    vg = jnp.take(uv_sampler[..., 1].astype(jnp.float32), f, axis=1).reshape(B, F, 3)
    tri_packed = jnp.stack(
        [xg[..., 0], yg[..., 0], xg[..., 1], yg[..., 1], xg[..., 2], yg[..., 2],
         wg[..., 0], wg[..., 1], wg[..., 2],
         ug[..., 0], vg[..., 0], ug[..., 1], vg[..., 1], ug[..., 2], vg[..., 2],
         jnp.zeros((B, F), jnp.float32)],
        axis=-1,
    )                                                                 # (B, F, 16)

    # face-chunk size (sublane aligned); pad with degenerate zero faces (area=0 -> ignored)
    if F <= 128:
        face_chunk = max(8, int(np.ceil(F / 8)) * 8)
        Fpad = face_chunk
    else:
        face_chunk = 128
        Fpad = int(np.ceil(F / face_chunk)) * face_chunk
    if Fpad > F:
        tri_packed = jnp.pad(tri_packed, ((0, 0), (0, Fpad - F), (0, 0)))

    # pixel tile (lane-dense, multiple of 128 when possible)
    tile_hw = _pick_tile(HW)

    # texture as (B, 3*TH, TW) bf16 for the MXU column-select (halves DMA + VMEM residency)
    tex2d = textures.reshape(B, 3 * TH, TW).astype(jnp.bfloat16)

    # Kernel 2: rasterize + texture.  Output already NCHW (permute([0,3,1,2]) fused).
    imgs = rasterize(tri_packed, tex2d, H, W, TH, TW, tile_hw, face_chunk)  # (B,3,H,W)
    return imgs


# -------------------------------------------------------------------- main --
if __name__ == "__main__":
    key = jax.random.PRNGKey(0)
    k1, k2, k3, k4 = jax.random.split(key, 4)

    B = 2
    img_size = 16

    # small octahedron mesh: 6 vertices, 8 faces
    base_verts = np.array(
        [[1, 0, 0], [-1, 0, 0], [0, 1, 0], [0, -1, 0], [0, 0, 1], [0, 0, -1]],
        dtype=np.float32,
    )
    base_faces = np.array(
        [[0, 2, 4], [2, 1, 4], [1, 3, 4], [3, 0, 4],
         [2, 0, 5], [1, 2, 5], [3, 1, 5], [0, 3, 5]],
        dtype=np.int32,
    )
    P, F = base_verts.shape[0], base_faces.shape[0]

    vertices = jnp.asarray(base_verts)[None] + 0.05 * jax.random.normal(k1, (B, P, 3), jnp.float32)
    faces = jnp.broadcast_to(jnp.asarray(base_faces)[None], (B, F, 3))

    # cams = [translation(3), quaternion(4, real part first)]
    trans = jnp.array([[0.05, -0.05, -3.0]] * B, jnp.float32) + 0.02 * jax.random.normal(k2, (B, 3))
    quat = jnp.concatenate(
        [jnp.ones((B, 1), jnp.float32), 0.1 * jax.random.normal(k3, (B, 3), jnp.float32)], axis=-1
    )
    cams = jnp.concatenate([trans, quat], axis=-1)                    # (B,7)

    # per-vertex uv sampler in [0,1]
    uv_sampler = jax.random.uniform(k4, (B, P, 2), jnp.float32)

    imgs = neural_renderer_forward(vertices, faces, cams, uv_sampler, img_size=img_size)
    imgs = jax.block_until_ready(imgs)

    assert imgs.shape == (B, 3, img_size, img_size)
    assert bool(jnp.all(jnp.isfinite(imgs)))
    print("KERNEL_OK")
</pallas_src>

<mosaic_0001>
module attributes {stable_mosaic.version = 11 : i64} {
  func.func @_project_kernel(%arg0: i32, %arg1: memref<1x3x128xf32, #tpu.memory_space<vmem>>, %arg2: memref<2x7xf32, #tpu.memory_space<smem>>, %arg3: memref<1x3x128xf32, #tpu.memory_space<vmem>>) attributes {dimension_semantics = [#tpu.dimension_semantics<arbitrary>], iteration_bounds = array<i64: 2>, scalar_prefetch = 0 : i64, scratch_operands = 0 : i64, tpu.core_type = #tpu.core_type<tc>, window_params = [{transform_indices = @transform_0, window_bounds = array<i64: 1, 3, 128>}, {transform_indices = @transform_1, window_bounds = array<i64: 2, 7>}, {transform_indices = @transform_2, window_bounds = array<i64: 1, 3, 128>}]} {
    %0 = arith.index_cast %arg0 : i32 to index
    %c0 = arith.constant 0 : index
    %1 = memref.load %arg2[%0, %c0] : memref<2x7xf32, #tpu.memory_space<smem>>
    %2 = arith.index_cast %arg0 : i32 to index
    %c1 = arith.constant 1 : index
    %3 = memref.load %arg2[%2, %c1] : memref<2x7xf32, #tpu.memory_space<smem>>
    %4 = arith.index_cast %arg0 : i32 to index
    %c2 = arith.constant 2 : index
    %5 = memref.load %arg2[%4, %c2] : memref<2x7xf32, #tpu.memory_space<smem>>
    %6 = arith.index_cast %arg0 : i32 to index
    %c3 = arith.constant 3 : index
    %7 = memref.load %arg2[%6, %c3] : memref<2x7xf32, #tpu.memory_space<smem>>
    %8 = arith.index_cast %arg0 : i32 to index
    %c4 = arith.constant 4 : index
    %9 = memref.load %arg2[%8, %c4] : memref<2x7xf32, #tpu.memory_space<smem>>
    %10 = arith.index_cast %arg0 : i32 to index
    %c5 = arith.constant 5 : index
    %11 = memref.load %arg2[%10, %c5] : memref<2x7xf32, #tpu.memory_space<smem>>
    %12 = arith.index_cast %arg0 : i32 to index
    %c6 = arith.constant 6 : index
    %13 = memref.load %arg2[%12, %c6] : memref<2x7xf32, #tpu.memory_space<smem>>
    %14 = arith.mulf %7, %7 : f32
    %15 = arith.mulf %9, %9 : f32
    %16 = arith.addf %14, %15 : f32
    %17 = arith.mulf %11, %11 : f32
    %18 = arith.addf %16, %17 : f32
    %19 = arith.mulf %13, %13 : f32
    %20 = arith.addf %18, %19 : f32
    %cst = arith.constant 2.000000e+00 : f32
    %21 = arith.divf %cst, %20 : f32
    %22 = arith.mulf %11, %11 : f32
    %23 = arith.mulf %13, %13 : f32
    %24 = arith.addf %22, %23 : f32
    %25 = arith.mulf %21, %24 : f32
    %cst_0 = arith.constant 1.000000e+00 : f32
    %26 = arith.subf %cst_0, %25 : f32
    %27 = arith.mulf %9, %11 : f32
    %28 = arith.mulf %13, %7 : f32
    %29 = arith.subf %27, %28 : f32
    %30 = arith.mulf %21, %29 : f32
    %31 = arith.mulf %9, %13 : f32
    %32 = arith.mulf %11, %7 : f32
    %33 = arith.addf %31, %32 : f32
    %34 = arith.mulf %21, %33 : f32
    %35 = arith.mulf %9, %11 : f32
    %36 = arith.mulf %13, %7 : f32
    %37 = arith.addf %35, %36 : f32
    %38 = arith.mulf %21, %37 : f32
    %39 = arith.mulf %9, %9 : f32
    %40 = arith.mulf %13, %13 : f32
    %41 = arith.addf %39, %40 : f32
    %42 = arith.mulf %21, %41 : f32
    %cst_1 = arith.constant 1.000000e+00 : f32
    %43 = arith.subf %cst_1, %42 : f32
    %44 = arith.mulf %11, %13 : f32
    %45 = arith.mulf %9, %7 : f32
    %46 = arith.subf %44, %45 : f32
    %47 = arith.mulf %21, %46 : f32
    %48 = arith.mulf %9, %13 : f32
    %49 = arith.mulf %11, %7 : f32
    %50 = arith.subf %48, %49 : f32
    %51 = arith.mulf %21, %50 : f32
    %52 = arith.mulf %11, %13 : f32
    %53 = arith.mulf %9, %7 : f32
    %54 = arith.addf %52, %53 : f32
    %55 = arith.mulf %21, %54 : f32
    %56 = arith.mulf %9, %9 : f32
    %57 = arith.mulf %11, %11 : f32
    %58 = arith.addf %56, %57 : f32
    %59 = arith.mulf %21, %58 : f32
    %cst_2 = arith.constant 1.000000e+00 : f32
    %60 = arith.subf %cst_2, %59 : f32
    %c0_3 = arith.constant 0 : index
    %c0_4 = arith.constant 0 : index
    %c0_5 = arith.constant 0 : index
    %61 = vector.load %arg1[%c0_3, %c0_4, %c0_5] : memref<1x3x128xf32, #tpu.memory_space<vmem>>, vector<1x1x128xf32>
    %62 = vector.shape_cast %61 : vector<1x1x128xf32> to vector<1x128xf32>
    %c0_6 = arith.constant 0 : index
    %c1_7 = arith.constant 1 : index
    %c0_8 = arith.constant 0 : index
    %63 = vector.load %arg1[%c0_6, %c1_7, %c0_8] : memref<1x3x128xf32, #tpu.memory_space<vmem>>, vector<1x1x128xf32>
    %64 = vector.shape_cast %63 : vector<1x1x128xf32> to vector<1x128xf32>
    %c0_9 = arith.constant 0 : index
    %c2_10 = arith.constant 2 : index
    %c0_11 = arith.constant 0 : index
    %65 = vector.load %arg1[%c0_9, %c2_10, %c0_11] : memref<1x3x128xf32, #tpu.memory_space<vmem>>, vector<1x1x128xf32>
    %66 = vector.shape_cast %65 : vector<1x1x128xf32> to vector<1x128xf32>
    %67 = vector.broadcast %1 : f32 to vector<1x128xf32>
    %68 = arith.addf %62, %67 : vector<1x128xf32>
    %69 = vector.broadcast %3 : f32 to vector<1x128xf32>
    %70 = arith.addf %64, %69 : vector<1x128xf32>
    %71 = vector.broadcast %5 : f32 to vector<1x128xf32>
    %72 = arith.addf %66, %71 : vector<1x128xf32>
    %73 = vector.broadcast %26 : f32 to vector<1x128xf32>
    %74 = arith.mulf %73, %68 : vector<1x128xf32>
    %75 = vector.broadcast %30 : f32 to vector<1x128xf32>
    %76 = arith.mulf %75, %70 : vector<1x128xf32>
    %77 = arith.addf %74, %76 : vector<1x128xf32>
    %78 = vector.broadcast %34 : f32 to vector<1x128xf32>
    %79 = arith.mulf %78, %72 : vector<1x128xf32>
    %80 = arith.addf %77, %79 : vector<1x128xf32>
    %81 = vector.broadcast %38 : f32 to vector<1x128xf32>
    %82 = arith.mulf %81, %68 : vector<1x128xf32>
    %83 = vector.broadcast %43 : f32 to vector<1x128xf32>
    %84 = arith.mulf %83, %70 : vector<1x128xf32>
    %85 = arith.addf %82, %84 : vector<1x128xf32>
    %86 = vector.broadcast %47 : f32 to vector<1x128xf32>
    %87 = arith.mulf %86, %72 : vector<1x128xf32>
    %88 = arith.addf %85, %87 : vector<1x128xf32>
    %89 = vector.broadcast %51 : f32 to vector<1x128xf32>
    %90 = arith.mulf %89, %68 : vector<1x128xf32>
    %91 = vector.broadcast %55 : f32 to vector<1x128xf32>
    %92 = arith.mulf %91, %70 : vector<1x128xf32>
    %93 = arith.addf %90, %92 : vector<1x128xf32>
    %94 = vector.broadcast %60 : f32 to vector<1x128xf32>
    %95 = arith.mulf %94, %72 : vector<1x128xf32>
    %96 = arith.addf %93, %95 : vector<1x128xf32>
    %cst_12 = arith.constant -1.000000e+00 : f32
    %97 = vector.broadcast %cst_12 : f32 to vector<1x128xf32>
    %98 = arith.mulf %96, %97 : vector<1x128xf32>
    %99 = math.absf %98 : vector<1x128xf32>
    %cst_13 = arith.constant 9.99999993E-9 : f32
    %100 = vector.broadcast %cst_13 : f32 to vector<1x128xf32>
    %101 = arith.cmpf ogt, %99, %100 : vector<1x128xf32>
    %102 = tpu.reciprocal %98 {approx = true} : vector<1x128xf32> -> vector<1x128xf32>
    %cst_14 = arith.constant 0.000000e+00 : f32
    %103 = vector.broadcast %cst_14 : f32 to vector<1x128xf32>
    %104 = arith.select %101, %102, %103 : vector<1x128xi1>, vector<1x128xf32>
    %cst_15 = arith.constant 1.000000e+00 : f32
    %105 = vector.broadcast %cst_15 : f32 to vector<1x128xf32>
    %106 = arith.mulf %80, %105 : vector<1x128xf32>
    %107 = arith.mulf %106, %104 : vector<1x128xf32>
    %c0_16 = arith.constant 0 : index
    %c0_17 = arith.constant 0 : index
    %c0_18 = arith.constant 0 : index
    %108 = vector.load %arg3[%c0_16, %c0_17, %c0_18] : memref<1x3x128xf32, #tpu.memory_space<vmem>>, vector<1x1x128xf32>
    %109 = vector.shape_cast %108 : vector<1x1x128xf32> to vector<1x128xf32>
    %110 = vector.shape_cast %107 : vector<1x128xf32> to vector<1x1x128xf32>
    tpu.vector_store %arg3[%c0_16, %c0_17, %c0_18], %110 {strides = array<i32>} : memref<1x3x128xf32, #tpu.memory_space<vmem>>, vector<1x1x128xf32>,
    %cst_19 = arith.constant 1.000000e+00 : f32
    %111 = vector.broadcast %cst_19 : f32 to vector<1x128xf32>
    %112 = arith.mulf %88, %111 : vector<1x128xf32>
    %113 = arith.mulf %112, %104 : vector<1x128xf32>
    %c0_20 = arith.constant 0 : index
    %c1_21 = arith.constant 1 : index
    %c0_22 = arith.constant 0 : index
    %114 = vector.load %arg3[%c0_20, %c1_21, %c0_22] : memref<1x3x128xf32, #tpu.memory_space<vmem>>, vector<1x1x128xf32>
    %115 = vector.shape_cast %114 : vector<1x1x128xf32> to vector<1x128xf32>
    %116 = vector.shape_cast %113 : vector<1x128xf32> to vector<1x1x128xf32>
    tpu.vector_store %arg3[%c0_20, %c1_21, %c0_22], %116 {strides = array<i32>} : memref<1x3x128xf32, #tpu.memory_space<vmem>>, vector<1x1x128xf32>,
    %c0_23 = arith.constant 0 : index
    %c2_24 = arith.constant 2 : index
    %c0_25 = arith.constant 0 : index
    %117 = vector.load %arg3[%c0_23, %c2_24, %c0_25] : memref<1x3x128xf32, #tpu.memory_space<vmem>>, vector<1x1x128xf32>
    %118 = vector.shape_cast %117 : vector<1x1x128xf32> to vector<1x128xf32>
    %119 = vector.shape_cast %98 : vector<1x128xf32> to vector<1x1x128xf32>
    tpu.vector_store %arg3[%c0_23, %c2_24, %c0_25], %119 {strides = array<i32>} : memref<1x3x128xf32, #tpu.memory_space<vmem>>, vector<1x1x128xf32>,
    return
  }
  func.func @transform_0(%arg0: i32) -> (i32, i32, i32) {
    %c0_i32 = arith.constant 0 : i32
    %c0_i32_0 = arith.constant 0 : i32
    %c0_i32_1 = arith.constant 0 : i32
    return %arg0, %c0_i32, %c0_i32_0 : i32, i32, i32
  }
  func.func @transform_1(%arg0: i32) -> (i32, i32) {
    %c0_i32 = arith.constant 0 : i32
    %c0_i32_0 = arith.constant 0 : i32
    %c0_i32_1 = arith.constant 0 : i32
    return %c0_i32, %c0_i32_0 : i32, i32
  }
  func.func @transform_2(%arg0: i32) -> (i32, i32, i32) {
    %c0_i32 = arith.constant 0 : i32
    %c0_i32_0 = arith.constant 0 : i32
    %c0_i32_1 = arith.constant 0 : i32
    return %arg0, %c0_i32, %c0_i32_0 : i32, i32, i32
  }
}

</mosaic_0001>

<bundles_post_ra>
// kernel: tpu_custom_call.1
= control target key start
LH: loop header
LB: loop body
LE: loop exit
PB: predicated region body
PF: predicated region fallthrough
CT: control target
= control target key end

     0   :  { %7 = vsyncpa [#allocation3], 0  ;;  %s393_s9 = smov 0   ;;  %s512_s0 = inlined_call_operand.vmem [shape: f32[2,3,128], index: 0, kind: input, shape index: {}]   ;;  %s513_s1 = inlined_call_operand.vmem [shape: f32[2,7], index: 1, kind: input, shape index: {}]   ;;  %s514_s2 = inlined_call_operand.vmem [shape: f32[2,3,128], index: 2, kind: output, shape index: {}]  }
   0x1 LB: > { %s399_s10 = sadd.s32 4294967295, %s375_s9   ;;  %p315_p0 = scmp.ge.s32.totalorder %s375_s9, 1  ;;  %s375_s9 = sphi %s393_s9, %s13_s9  }
   0x2   : > { %p91_p1 = scmp.lt.s32.totalorder %s375_s9, 3  ;;  %s104_s13 = sshll.u32 %s513_s1, 4  ;;  %s105_s13 = int_to_ptr.vmem [resolvable:$true] %s104_s13 }
   0x3   : > { %p335_p3 = scmp.eq.s32.totalorder %s399_s10, 0  ;;  %s350_s15 = scalar_lea.vmem %s105_s13, 32 }
   0x4   : > { %p406_p2 = pnand %p315_p0, %p91_p1  ;;  %p351_p6 = scmp.ne.s32.totalorder %s105_s13, %s350_s15 }
   0x5   : > { %p358_p10 = scmp.lt.s32.totalorder %s105_s13, %s105_s13  ;;  %p359_p11 = scmp.lt.s32.totalorder %s350_s15, %s350_s15 }
   0x6   : > { %p331_p4 = pneg %p406_p2 }
   0x7   : > { %p360_p12 = por %p359_p11, %p358_p10 }
   0x8   : > { %p332_p5 = pnand %p335_p3, %p331_p4 }
   0xa   : > { %p352_p7 = pneg %p332_p5 }
   0xc   : > { %p353_p8 = pnand %p352_p7, %p351_p6 }
   0xe   : > { %p354_p9 = pneg %p353_p8 }
  0x10   : > { %p361_p13 = pnand %p360_p12, %p354_p9 }
  0x12   : > { %364 = shalt.err (!%p361_p13)
}
  0x13   : > { %s377_s16 = smov [#allocation2]   ;;  %124 = sbr.rel (%p406_p2) target bundleno = 148 (0x94), region = 28 }
  0x14   : > { %334 = dma.vmem_to_smem (!%p332_p5), %s105_s13, 32, %s377_s16, [#allocation3]  }
  0x18   : > { %370 = dma.done.wait (%p335_p3), [#allocation3], 32  }
  0x19   : > { %372 = vsyncadd (%p335_p3), [#allocation3], 4294967264 }
  0x1a   : > { %130 = sfence }
  0x1b   : > { %s422_s17 = sshll.u32 %s399_s10, 7  ;;  %p145_p0 = scmp.lt.s32.totalorder %s399_s10, 1 }
  0x1c   : > { %s159_s18 = sadd.s32 3, %s422_s17  ;;  %s161_s19 = sadd.s32 4, %s422_s17 }
  0x1d   : > { %s160_s20 = sld [smem:[#allocation2 + %s159_s18]]  ;;  %s163_s21 = sadd.s32 5, %s422_s17 }
  0x1e   : > { %s162_s22 = sld [smem:[#allocation2 + %s161_s19]]  ;;  %s165_s23 = sadd.s32 6, %s422_s17 }
  0x1f   : > { %s164_s24 = sld [smem:[#allocation2 + %s163_s21]]  ;;  %s521_s10 = smov (!%p145_p0, %s399_s10), 1 }
  0x20   : > { %s166_s25 = sld [smem:[#allocation2 + %s165_s23]] }
  0x23   : > { %s167_s26 = smul.f32 %s160_s20, %s160_s20 }
  0x24   : > { %s428_s27 = smul.f32 %s162_s22, %s162_s22 }
  0x25   : > { %s430_s28 = smul.f32 %s164_s24, %s164_s24 }
  0x26   : > { %s169_s29 = sadd.f32 %s428_s27, %s167_s26  ;;  %s433_s30 = smul.f32 %s166_s25, %s166_s25 }
  0x27   : > { %s437_s4 = smul.f32 %s164_s24, %s162_s22 }
  0x28   : > { %s171_s5 = sadd.f32 %s430_s28, %s169_s29  ;;  %s440_s6 = smul.f32 %s166_s25, %s160_s20 }
  0x29   : > { %s178_s7 = sadd.f32 %s433_s30, %s430_s28  ;;  %s444_s8 = smul.f32 %s166_s25, %s162_s22 }
  0x2a   : > { %s173_s11 = sadd.f32 %s433_s30, %s171_s5  ;;  %s447_s12 = smul.f32 %s164_s24, %s160_s20 }
  0x2b   : > { %s191_s13 = sadd.f32 %s433_s30, %s428_s27  ;;  %s451_s14 = smul.f32 %s166_s25, %s164_s24 }
  0x2c   : > { %v174_v0 = vstv %s173_s11  ;;  %s453_s15 = smul.f32 %s162_s22, %s160_s20  ;;  %s183_s16 = ssub.f32 %s437_s4, %s440_s6 }
  0x2d   : > { %346 = vrcp.f32 %v174_v0  ;;  %s187_s18 = sadd.f32 %s447_s12, %s444_s8  ;;  %s155_s24 = sadd.s32 1, %s422_s17 }
  0x2e   : > { %s189_s19 = sadd.f32 %s440_s6, %s437_s4  ;;  %s157_s25 = sadd.s32 2, %s422_s17 }
  0x2f   : > { %s156_s20 = sld [smem:[#allocation2 + %s155_s24]]  ;;  %s320_s29 = sshll.u32 %s521_s10, 2 }
  0x30   : > { %s158_s22 = sld [smem:[#allocation2 + %s157_s25]]  ;;  %s148_s26 = scalar_lea.vmem %s512_s0, %s320_s29 }
  0x31   : > { %s154_s5 = sld [smem:[#allocation2 + %s422_s17]]  ;;  %v206_v2 = vld [vmem:[%s148_s26 + $0x1] sm:$0x1]  ;;  %v207_v4 = vld [vmem:[%s148_s26 + $0x2] sm:$0x1] }
  0x32   : > { %v205_v6 = vld [vmem:[%s148_s26] sm:$0x1]  ;;  %s519_s6 = sadd.f32 %s430_s28, %s428_s27  ;;  %s152_s28 = scalar_lea.vmem %s514_s2, %s320_s29 }
  0x35   : > { %v210_v3 = vstv %s156_s20 }
  0x36   : > { %v212_v5 = vstv %s158_s22  ;;  %v211_v8 = vadd.f32 %v210_v3, %v206_v2  ;;  %s517_s22 = ssub.f32 %s444_s8, %s447_s12 }
  0x37   : > { %v208_v7 = vstv %s154_s5  ;;  %v213_v9 = vadd.f32 %v212_v5, %v207_v4 }
  0x38   : > { %v209_v10 = vadd.f32 %v208_v7, %v205_v6 }
  0x3a   : > { %v347_v1 = vpop.eup %346 }
  0x3b   : > { %325 = vpush %v347_v1 }
  0x6c   : > { %s326_s23 = spop %325 }
  0x6d   : > { %s177_s21 = smul.f32 2.0, %s326_s23 }
  0x6f   : > { %s179_s17 = smul.f32 %s178_s7, %s177_s21  ;;  %s516_s7 = ssub.f32 %s451_s14, %s453_s15 }
  0x70   : > { %s184_s24 = smul.f32 %s183_s16, %s177_s21 }
  0x71   : > { %s180_s3 = ssub.f32 1.0, %s179_s17  ;;  %s188_s25 = smul.f32 %s187_s18, %s177_s21 }
  0x72   : > { %s190_s23 = smul.f32 %s189_s19, %s177_s21  ;;  %v216_v11 = vstv %s184_s24  ;;  %s518_s18 = sadd.f32 %s453_s15, %s451_s14 }
  0x73   : > { %s192_s26 = smul.f32 %s191_s13, %s177_s21  ;;  %v214_v12 = vstv %s180_s3  ;;  %v217_v13 = vmul.f32 %v216_v11, %v211_v8  ;;  %v219_v14 = vstv %s188_s25 }
  0x74   : > { %s197_s16 = smul.f32 %s516_s7, %s177_s21  ;;  %v215_v15 = vmul.f32 %v214_v12, %v209_v10  ;;  %v220_v16 = vmul.f32 %v219_v14, %v213_v9  ;;  %v222_v17 = vstv %s190_s23 }
  0x75   : > { %s193_s20 = ssub.f32 1.0, %s192_s26  ;;  %s199_s5 = smul.f32 %s517_s22, %s177_s21  ;;  %v223_v18 = vmul.f32 %v222_v17, %v209_v10 }
  0x76   : > { %s201_s4 = smul.f32 %s518_s18, %s177_s21  ;;  %v218_v19 = vadd.f32 %v217_v13, %v215_v15  ;;  %v227_v20 = vstv %s197_s16 }
  0x77   : > { %s203_s19 = smul.f32 %s519_s6, %s177_s21  ;;  %v224_v21 = vstv %s193_s20  ;;  %v228_v22 = vmul.f32 %v227_v20, %v213_v9  ;;  %v230_v23 = vstv %s199_s5 }
  0x78   : > { %v221_v24 = vadd.f32 %v220_v16, %v218_v19  ;;  %v225_v25 = vmul.f32 %v224_v21, %v211_v8  ;;  %v231_v26 = vmul.f32 %v230_v23, %v209_v10  ;;  %v232_v27 = vstv %s201_s4 }
  0x79   : > { %s204_s30 = ssub.f32 1.0, %s203_s19  ;;  %v233_v28 = vmul.f32 %v232_v27, %v211_v8 }
  0x7a   : > { %v226_v29 = vadd.f32 %v225_v25, %v223_v18 }
  0x7b   : > { %v234_v30 = vadd.f32 %v233_v28, %v231_v26  ;;  %v235_v31 = vstv %s204_s30 }
  0x7c   : > { %v229_v32 = vadd.f32 %v228_v22, %v226_v29  ;;  %v236_v33 = vmul.f32 %v235_v31, %v213_v9 }
  0x7e   : > { %v237_v34 = vadd.f32 %v236_v33, %v234_v30 }
  0x80   : > { %v238_v35 = vmul.f32 -1.0, %v237_v34 }
  0x82   : > { %348 = vrcp.f32 %v238_v35  ;;  %247 = vst [vmem:[%s152_s28 + $0x2] sm:$0x1] %v238_v35  ;;  %v239_v36 = vand.u32 2147483647, %v238_v35 }
  0x84   : > { %vm240_vm0 = vcmp.gt.f32.partialorder %v239_v36, 1e-08 }
  0x8f   : > { %v349_v37 = vpop.eup %348 }
  0x90   : > { %v242_v38 = vsel %vm240_vm0, %v349_v37, 0.0 }
  0x91   : > { %v243_v39 = vmul.f32 %v242_v38, %v221_v24  ;;  %v245_v40 = vmul.f32 %v242_v38, %v229_v32 }
  0x93   : > { %244 = vst [vmem:[%s152_s28] sm:$0x1] %v243_v39  ;;  %246 = vst [vmem:[%s152_s28 + $0x1] sm:$0x1] %v245_v40 }
  0x94 PF: > { %s13_s9 = sadd.s32 1, %s375_s9  }
  0x95   : > { %p10_p1 = scmp.ge.s32.totalorder %s13_s9, 4  }
  0x97   :  { %12 = sbr.rel (!%p10_p1) target bundleno = 1 (0x1), region = 63 }
  0x9c   :  { %267 = vsyncpa [#allocation3], 1 }
  0x9d   :  { %269 = vsyncpa [#allocation3 + $0x1], 1 }

</bundles_post_ra>
